<compile_context>
chip_gen: v6e
topology: v6e:2x2x1
jax: 0.10.0
libtpu: 0.0.40
codegen_flags: <defaults>
</compile_context>

<pallas_src>
import functools

import jax
import jax.numpy as jnp
from jax import lax
from jax.experimental import pallas as pl
from jax.experimental.pallas import tpu as pltpu


# --------------------------------------------------------------------------- helpers

def _round_up(x, m):
    return (x + m - 1) // m * m


def _padded_block_bytes(shape, itemsize=4):
    """VMEM bytes of ONE buffered copy of an f32 block: last dim padded to 128 lanes,
    second-to-last to 8 sublanes."""
    dims = list(shape)
    dims[-1] = _round_up(dims[-1], 128)
    if len(dims) >= 2:
        dims[-2] = _round_up(dims[-2], 8)
    n = 1
    for d in dims:
        n *= d
    return n * itemsize


def _tpu_vmem_capacity_bytes():
    """Per-core VMEM capacity; conservative 64 MiB (v7x-class) if the query fails."""
    try:
        info = pltpu.get_tpu_info()
        for name in ("vmem_capacity_bytes", "vmem_size_bytes", "vmem_bytes"):
            v = getattr(info, name, None)
            if v:
                return int(v)
    except Exception:
        pass
    return 64 * 1024 * 1024


def _pick_tiling(B, S_pad, H, has_mask):
    """Choose the per-step batch block Bt from the PADDED block footprint and a
    generation-aware VMEM budget.  Returns (Bt, B_pad, vmem_limit_bytes)."""
    cap = _tpu_vmem_capacity_bytes()
    headroom = max(12 << 20, cap // 8)          # Mosaic internal scratch / semaphores
    budget = cap - headroom                     # ~52 MiB on v7x, ~112 MiB on v5e/v6e

    # Constant weight blocks; counted double-buffered even if Buffered(1) is granted.
    weight_bytes = 2 * (_padded_block_bytes((H, H)) + _padded_block_bytes((1, 1, H)))

    # Per-batch-element, double-buffered pipelined blocks (true padded tile sizes).
    per_b = 2 * (2 * _padded_block_bytes((1, S_pad, H))        # x in + out blocks
                 + _padded_block_bytes((1, 1, H))              # decoder projection
                 + _padded_block_bytes((1, S_pad, 1))          # attn out (128-lane pad)
                 + (_padded_block_bytes((1, S_pad, 1)) if has_mask else 0))

    avail = budget - weight_bytes - (2 << 20)
    bt = int(max(1, min(B, avail // per_b)))
    if cap <= (80 << 20) and B >= 2:
        # v7x-class part (64 MiB/TC, 2 TensorCores): keep >= 2 parallel grid steps.
        bt = min(bt, -(-B // 2))
    b_pad = -(-B // bt) * bt

    need = bt * per_b + weight_bytes + (4 << 20)
    vmem_limit = int(min(max(need, 32 << 20), cap - (8 << 20)))
    return bt, b_pad, vmem_limit


# ---------------------------------------------------------------------------- kernel

def _attn_body(x_ref, dp_ref, m_ref, wenc_ref, vvec_ref, out_ref, attn_ref, *, s_valid):
    bt, s, h = x_ref.shape                                     # s is the padded S (%8==0)

    enc = x_ref[...]                                           # (Bt, S, H)

    # tanh(W[cat(enc, dec)]) == tanh(enc @ Wenc^T + (dec @ Wdec^T + bW)); the decoder
    # half (dp_ref, (Bt,1,H)) was precomputed in the wrapper.  s % 8 == 0 is
    # guaranteed by the wrapper, so the merge/split below is layout-free.
    pre = jnp.dot(enc.reshape(bt * s, h), wenc_ref[...],
                  preferred_element_type=jnp.float32)          # (Bt*S, H)  MXU
    t = jnp.tanh(pre.reshape(bt, s, h) + dp_ref[...])          # (Bt, S, H)

    # sum over hidden of V(t): VPU multiply + XLU lane reduce with v_vec = V^T @ 1.
    score = jnp.sum(t * vvec_ref[...], axis=-1, keepdims=True)  # (Bt, S, 1)

    if m_ref is not None:
        # masked_fill(mask == 0, -1e9): exact reference semantics (fully-masked rows
        # degenerate to a uniform softmax, matching the PyTorch module).  Padded S
        # positions carry mask==0 from the wrapper and are handled here too.
        score = jnp.where(m_ref[...] > 0.5, score, jnp.float32(-1e9))
    elif s_valid != s:
        # No user mask but S was padded: neutralize the padded positions.
        pos = lax.broadcasted_iota(jnp.int32, (bt, s, 1), 1)
        score = jnp.where(pos < s_valid, score, jnp.float32(-1e9))

    # Softmax over the sequence axis, fully inside one block.
    mx = jnp.max(score, axis=1, keepdims=True)                 # (Bt, 1, 1)
    e = jnp.exp(score - mx)
    denom = jnp.sum(e, axis=1, keepdims=True)
    attn = e * pl.reciprocal(denom, approx=True)               # (Bt, S, 1)

    attn_ref[...] = attn
    out_ref[...] = enc * attn                                  # (Bt, S, H)


def _attn_kernel_masked(x_ref, dp_ref, m_ref, wenc_ref, vvec_ref, out_ref, attn_ref,
                        *, s_valid):
    _attn_body(x_ref, dp_ref, m_ref, wenc_ref, vvec_ref, out_ref, attn_ref,
               s_valid=s_valid)


def _attn_kernel_nomask(x_ref, dp_ref, wenc_ref, vvec_ref, out_ref, attn_ref, *, s_valid):
    _attn_body(x_ref, dp_ref, None, wenc_ref, vvec_ref, out_ref, attn_ref,
               s_valid=s_valid)


# --------------------------------------------------------------------------- wrapper

def attn_forward(inputs, hidden_states, W_weight, W_bias, V_weight, V_bias, mask=None):
    """inputs: (B,S,H); hidden_states: (L,B,H); mask: (B,S) or None.
    Returns (outputs (B,S,H), x_attn (B,S,1)) — same semantics as Attn.forward."""
    inputs = jnp.asarray(inputs, jnp.float32)
    B, S, H = inputs.shape

    # ---- host-side algebraic prework (hoisted out of the kernel) ----
    W_weight = jnp.asarray(W_weight, jnp.float32)
    Wenc_t = W_weight[:, :H].T                                         # (H, H)
    Wdec_t = W_weight[:, H:].T                                         # (H, H)
    dec_last = jnp.asarray(hidden_states, jnp.float32)[-1]             # (B, H)
    dec_proj = (dec_last @ Wdec_t
                + jnp.asarray(W_bias, jnp.float32)).reshape(B, 1, H)   # (B, 1, H)
    # V folded to a matvec; the +sum(V_bias) constant cancels in the softmax.
    v_vec = jnp.sum(jnp.asarray(V_weight, jnp.float32), axis=0).reshape(1, 1, H)
    del V_bias  # softmax-invariant constant shift; intentionally unused

    has_mask = mask is not None

    # ---- padding + tiling (generation-aware, padded-tile accounting) ----
    S_pad = _round_up(S, 8)
    Bt, B_pad, vmem_limit = _pick_tiling(B, S_pad, H, has_mask)
    grid = (B_pad // Bt,)

    if B_pad != B or S_pad != S:
        inputs_p = jnp.pad(inputs, ((0, B_pad - B), (0, S_pad - S), (0, 0)))
    else:
        inputs_p = inputs
    dec_proj_p = (jnp.pad(dec_proj, ((0, B_pad - B), (0, 0), (0, 0)))
                  if B_pad != B else dec_proj)
    args = [inputs_p, dec_proj_p]
    if has_mask:
        mask_f = jnp.asarray(mask, jnp.float32).reshape(B, S, 1)
        if B_pad != B or S_pad != S:
            # zeros in the padding -> -1e9 in the kernel -> zero attention weight
            mask_f = jnp.pad(mask_f, ((0, B_pad - B), (0, S_pad - S), (0, 0)))
        args.append(mask_f)
    args += [Wenc_t, v_vec]

    per_batch3 = lambda i: (i, 0, 0)
    kernel_fn = _attn_kernel_masked if has_mask else _attn_kernel_nomask
    kernel = functools.partial(kernel_fn, s_valid=S)

    def _run(single_buffer_weights):
        in_specs = [
            pl.BlockSpec((Bt, S_pad, H), per_batch3),       # encoder outputs
            pl.BlockSpec((Bt, 1, H), per_batch3),           # hoisted decoder projection
        ]
        if has_mask:
            in_specs.append(pl.BlockSpec((Bt, S_pad, 1), per_batch3))
        wkw = {}
        if single_buffer_weights and hasattr(pl, "Buffered"):
            wkw = dict(pipeline_mode=pl.Buffered(1))        # constant blocks: 1 buffer
        in_specs.append(pl.BlockSpec((H, H), lambda i: (0, 0), **wkw))       # Wenc^T
        in_specs.append(pl.BlockSpec((1, 1, H), lambda i: (0, 0, 0), **wkw))  # v_vec
        out_specs = [
            pl.BlockSpec((Bt, S_pad, H), per_batch3),
            pl.BlockSpec((Bt, S_pad, 1), per_batch3),
        ]
        return pl.pallas_call(
            kernel,
            out_shape=(
                jax.ShapeDtypeStruct((B_pad, S_pad, H), jnp.float32),
                jax.ShapeDtypeStruct((B_pad, S_pad, 1), jnp.float32),
            ),
            grid_spec=pltpu.PrefetchScalarGridSpec(
                num_scalar_prefetch=0,
                grid=grid,
                in_specs=in_specs,
                out_specs=out_specs,
            ),
            compiler_params=pltpu.CompilerParams(
                dimension_semantics=("parallel",),
                vmem_limit_bytes=vmem_limit),
        )(*args)

    try:
        out_p, attn_p = _run(True)
    except Exception:
        # Fallback if this runtime rejects single-buffered constant blocks.
        out_p, attn_p = _run(False)

    return out_p[:B, :S, :], attn_p[:B, :S, :]


# ------------------------------------------------------------------------- reference

def attn_reference(inputs, hidden_states, W_weight, W_bias, V_weight, V_bias, mask=None):
    """Pure-JAX reference matching the PyTorch forward exactly."""
    B, S, H = inputs.shape
    dec = jnp.repeat(hidden_states[-1][:, None, :], S, axis=1)   # (B, S, H)
    cat = jnp.concatenate([inputs, dec], axis=2)                 # (B, S, 2H)
    x = jnp.tanh(cat @ W_weight.T + W_bias)
    x = x @ V_weight.T + V_bias
    x = jnp.sum(x, axis=2, keepdims=True)                        # (B, S, 1)
    if mask is not None:
        inv = (1 - mask).astype(bool)[..., None]
        x = jnp.where(inv, -1e9, x)
    x_attn = jax.nn.softmax(x, axis=1)
    return inputs * x_attn, x_attn


if __name__ == "__main__":
    B, S, H, L = 2, 8, 32, 2

    key = jax.random.PRNGKey(0)
    k = jax.random.split(key, 8)
    inputs = jax.random.normal(k[0], (B, S, H), dtype=jnp.float32)
    hidden_states = jax.random.normal(k[1], (L, B, H), dtype=jnp.float32)

    bound_w = 1.0 / jnp.sqrt(2.0 * H)
    bound_v = 1.0 / jnp.sqrt(1.0 * H)
    W_weight = jax.random.uniform(k[2], (H, 2 * H), jnp.float32, -bound_w, bound_w)
    W_bias = jax.random.uniform(k[3], (H,), jnp.float32, -bound_w, bound_w)
    V_weight = jax.random.uniform(k[4], (H, H), jnp.float32, -bound_v, bound_v)
    V_bias = jax.random.uniform(k[5], (H,), jnp.float32, -bound_v, bound_v)

    # mask: 1 = real token, 0 = padding (last two positions of batch 1 padded)
    mask = jnp.ones((B, S), dtype=jnp.int32).at[1, -2:].set(0)

    out, x_attn = attn_forward(inputs, hidden_states, W_weight, W_bias,
                               V_weight, V_bias, mask)
    jax.block_until_ready((out, x_attn))
    ref_out, ref_attn = attn_reference(inputs, hidden_states, W_weight, W_bias,
                                       V_weight, V_bias, mask)
    # approx (EUP) softmax reciprocal + dropped softmax-invariant +sum(bV) constant:
    # compare at 1e-3 rather than 1e-5.
    assert jnp.allclose(out, ref_out, atol=1e-3, rtol=1e-3)
    assert jnp.allclose(x_attn, ref_attn, atol=1e-3, rtol=1e-3)

    # Specialized mask=None path.
    out2, attn2 = attn_forward(inputs, hidden_states, W_weight, W_bias,
                               V_weight, V_bias, None)
    jax.block_until_ready((out2, attn2))
    ref_out2, ref_attn2 = attn_reference(inputs, hidden_states, W_weight, W_bias,
                                         V_weight, V_bias, None)
    assert jnp.allclose(out2, ref_out2, atol=1e-3, rtol=1e-3)
    assert jnp.allclose(attn2, ref_attn2, atol=1e-3, rtol=1e-3)

    # Awkward shapes: B not a multiple of the block batch, S not a multiple of 8
    # (exercises the wrapper padding + in-kernel iota mask for padded positions).
    B3, S3 = 3, 6
    inp3 = jax.random.normal(k[6], (B3, S3, H), dtype=jnp.float32)
    hid3 = jax.random.normal(k[7], (L, B3, H), dtype=jnp.float32)
    out3, attn3 = attn_forward(inp3, hid3, W_weight, W_bias, V_weight, V_bias, None)
    jax.block_until_ready((out3, attn3))
    ref_out3, ref_attn3 = attn_reference(inp3, hid3, W_weight, W_bias,
                                         V_weight, V_bias, None)
    assert jnp.allclose(out3, ref_out3, atol=1e-3, rtol=1e-3)
    assert jnp.allclose(attn3, ref_attn3, atol=1e-3, rtol=1e-3)

    print("KERNEL_OK")
</pallas_src>

<mosaic_0001>
module attributes {stable_mosaic.version = 11 : i64} {
  func.func @_attn_kernel_masked(%arg0: i32, %arg1: memref<1x8x32xf32, #tpu.memory_space<vmem>>, %arg2: memref<1x1x32xf32, #tpu.memory_space<vmem>>, %arg3: memref<1x8x1xf32, #tpu.memory_space<vmem>>, %arg4: memref<32x32xf32, #tpu.memory_space<vmem>>, %arg5: memref<1x1x32xf32, #tpu.memory_space<vmem>>, %arg6: memref<1x8x32xf32, #tpu.memory_space<vmem>>, %arg7: memref<1x8x1xf32, #tpu.memory_space<vmem>>) attributes {dimension_semantics = [#tpu.dimension_semantics<parallel>], iteration_bounds = array<i64: 2>, scalar_prefetch = 0 : i64, scratch_operands = 0 : i64, tpu.core_type = #tpu.core_type<tc>, window_params = [{transform_indices = @transform_0, window_bounds = array<i64: 1, 8, 32>}, {transform_indices = @transform_1, window_bounds = array<i64: 1, 1, 32>}, {transform_indices = @transform_2, window_bounds = array<i64: 1, 8, 1>}, {pipeline_mode = #tpu.pipeline_mode<synchronous>, transform_indices = @transform_3, window_bounds = array<i64: 32, 32>}, {pipeline_mode = #tpu.pipeline_mode<synchronous>, transform_indices = @transform_4, window_bounds = array<i64: 1, 1, 32>}, {transform_indices = @transform_5, window_bounds = array<i64: 1, 8, 32>}, {transform_indices = @transform_6, window_bounds = array<i64: 1, 8, 1>}]} {
    %c0 = arith.constant 0 : index
    %c0_0 = arith.constant 0 : index
    %c0_1 = arith.constant 0 : index
    %0 = vector.load %arg1[%c0, %c0_0, %c0_1] : memref<1x8x32xf32, #tpu.memory_space<vmem>>, vector<1x8x32xf32>
    %1 = vector.shape_cast %0 : vector<1x8x32xf32> to vector<8x32xf32>
    %c0_2 = arith.constant 0 : index
    %c0_3 = arith.constant 0 : index
    %2 = vector.load %arg4[%c0_2, %c0_3] : memref<32x32xf32, #tpu.memory_space<vmem>>, vector<32x32xf32>
    %cst = arith.constant dense<0.000000e+00> : vector<8x32xf32>
    %3 = tpu.matmul %1, %2, %cst {dimension_numbers = #tpu.dot_dimension_numbers<[1], [0], [0], [1], [0, 0, 1, 1], [], []>} : vector<8x32xf32>, vector<32x32xf32>, vector<8x32xf32> -> vector<8x32xf32>
    %4 = vector.shape_cast %3 : vector<8x32xf32> to vector<1x8x32xf32>
    %c0_4 = arith.constant 0 : index
    %c0_5 = arith.constant 0 : index
    %c0_6 = arith.constant 0 : index
    %5 = vector.load %arg2[%c0_4, %c0_5, %c0_6] : memref<1x1x32xf32, #tpu.memory_space<vmem>>, vector<1x1x32xf32>
    %6 = vector.broadcast %5 : vector<1x1x32xf32> to vector<1x8x32xf32>
    %7 = arith.addf %4, %6 : vector<1x8x32xf32>
    %8 = math.tanh %7 : vector<1x8x32xf32>
    %c0_7 = arith.constant 0 : index
    %c0_8 = arith.constant 0 : index
    %c0_9 = arith.constant 0 : index
    %9 = vector.load %arg5[%c0_7, %c0_8, %c0_9] : memref<1x1x32xf32, #tpu.memory_space<vmem>>, vector<1x1x32xf32>
    %10 = vector.broadcast %9 : vector<1x1x32xf32> to vector<1x8x32xf32>
    %11 = arith.mulf %8, %10 : vector<1x8x32xf32>
    %cst_10 = arith.constant dense<0.000000e+00> : vector<1x8xf32>
    %12 = vector.multi_reduction <add>, %11, %cst_10 [2] : vector<1x8x32xf32> to vector<1x8xf32>
    %13 = vector.shape_cast %12 : vector<1x8xf32> to vector<1x8x1xf32>
    %c0_11 = arith.constant 0 : index
    %c0_12 = arith.constant 0 : index
    %c0_13 = arith.constant 0 : index
    %14 = vector.load %arg3[%c0_11, %c0_12, %c0_13] : memref<1x8x1xf32, #tpu.memory_space<vmem>>, vector<1x8x1xf32>
    %cst_14 = arith.constant 5.000000e-01 : f32
    %15 = vector.broadcast %cst_14 : f32 to vector<1x8x1xf32>
    %16 = arith.cmpf ogt, %14, %15 : vector<1x8x1xf32>
    %cst_15 = arith.constant -1.000000e+09 : f32
    %17 = vector.broadcast %cst_15 : f32 to vector<1x8x1xf32>
    %18 = arith.select %16, %13, %17 : vector<1x8x1xi1>, vector<1x8x1xf32>
    %cst_16 = arith.constant dense<0xFF800000> : vector<1x1xf32>
    %19 = vector.multi_reduction <maximumf>, %18, %cst_16 [1] : vector<1x8x1xf32> to vector<1x1xf32>
    %20 = vector.shape_cast %19 : vector<1x1xf32> to vector<1x1x1xf32>
    %21 = vector.broadcast %20 : vector<1x1x1xf32> to vector<1x8x1xf32>
    %22 = arith.subf %18, %21 : vector<1x8x1xf32>
    %23 = math.exp %22 : vector<1x8x1xf32>
    %cst_17 = arith.constant dense<0.000000e+00> : vector<1x1xf32>
    %24 = vector.multi_reduction <add>, %23, %cst_17 [1] : vector<1x8x1xf32> to vector<1x1xf32>
    %25 = vector.shape_cast %24 : vector<1x1xf32> to vector<1x1x1xf32>
    %26 = tpu.reciprocal %25 {approx = true} : vector<1x1x1xf32> -> vector<1x1x1xf32>
    %27 = vector.broadcast %26 : vector<1x1x1xf32> to vector<1x8x1xf32>
    %28 = arith.mulf %23, %27 : vector<1x8x1xf32>
    %c0_18 = arith.constant 0 : index
    %c0_19 = arith.constant 0 : index
    %c0_20 = arith.constant 0 : index
    %29 = vector.load %arg7[%c0_18, %c0_19, %c0_20] : memref<1x8x1xf32, #tpu.memory_space<vmem>>, vector<1x8x1xf32>
    tpu.vector_store %arg7[%c0_18, %c0_19, %c0_20], %28 {strides = array<i32>} : memref<1x8x1xf32, #tpu.memory_space<vmem>>, vector<1x8x1xf32>,
    %30 = vector.broadcast %28 : vector<1x8x1xf32> to vector<1x8x32xf32>
    %31 = arith.mulf %0, %30 : vector<1x8x32xf32>
    %c0_21 = arith.constant 0 : index
    %c0_22 = arith.constant 0 : index
    %c0_23 = arith.constant 0 : index
    %32 = vector.load %arg6[%c0_21, %c0_22, %c0_23] : memref<1x8x32xf32, #tpu.memory_space<vmem>>, vector<1x8x32xf32>
    tpu.vector_store %arg6[%c0_21, %c0_22, %c0_23], %31 {strides = array<i32>} : memref<1x8x32xf32, #tpu.memory_space<vmem>>, vector<1x8x32xf32>,
    return
  }
  func.func @transform_0(%arg0: i32) -> (i32, i32, i32) {
    %c0_i32 = arith.constant 0 : i32
    %c0_i32_0 = arith.constant 0 : i32
    %c0_i32_1 = arith.constant 0 : i32
    return %arg0, %c0_i32, %c0_i32_0 : i32, i32, i32
  }
  func.func @transform_1(%arg0: i32) -> (i32, i32, i32) {
    %c0_i32 = arith.constant 0 : i32
    %c0_i32_0 = arith.constant 0 : i32
    %c0_i32_1 = arith.constant 0 : i32
    return %arg0, %c0_i32, %c0_i32_0 : i32, i32, i32
  }
  func.func @transform_2(%arg0: i32) -> (i32, i32, i32) {
    %c0_i32 = arith.constant 0 : i32
    %c0_i32_0 = arith.constant 0 : i32
    %c0_i32_1 = arith.constant 0 : i32
    return %arg0, %c0_i32, %c0_i32_0 : i32, i32, i32
  }
  func.func @transform_3(%arg0: i32) -> (i32, i32) {
    %c0_i32 = arith.constant 0 : i32
    %c0_i32_0 = arith.constant 0 : i32
    %c0_i32_1 = arith.constant 0 : i32
    return %c0_i32, %c0_i32_0 : i32, i32
  }
  func.func @transform_4(%arg0: i32) -> (i32, i32, i32) {
    %c0_i32 = arith.constant 0 : i32
    %c0_i32_0 = arith.constant 0 : i32
    %c0_i32_1 = arith.constant 0 : i32
    %c0_i32_2 = arith.constant 0 : i32
    return %c0_i32, %c0_i32_0, %c0_i32_1 : i32, i32, i32
  }
  func.func @transform_5(%arg0: i32) -> (i32, i32, i32) {
    %c0_i32 = arith.constant 0 : i32
    %c0_i32_0 = arith.constant 0 : i32
    %c0_i32_1 = arith.constant 0 : i32
    return %arg0, %c0_i32, %c0_i32_0 : i32, i32, i32
  }
  func.func @transform_6(%arg0: i32) -> (i32, i32, i32) {
    %c0_i32 = arith.constant 0 : i32
    %c0_i32_0 = arith.constant 0 : i32
    %c0_i32_1 = arith.constant 0 : i32
    return %arg0, %c0_i32, %c0_i32_0 : i32, i32, i32
  }
}

module attributes {stable_mosaic.version = 11 : i64} {
  func.func @_attn_kernel_masked(%arg0: i32, %arg1: memref<1x8x32xf32, #tpu.memory_space<vmem>>, %arg2: memref<1x1x32xf32, #tpu.memory_space<vmem>>, %arg3: memref<1x8x1xf32, #tpu.memory_space<vmem>>, %arg4: memref<32x32xf32, #tpu.memory_space<vmem>>, %arg5: memref<1x1x32xf32, #tpu.memory_space<vmem>>, %arg6: memref<1x8x32xf32, #tpu.memory_space<vmem>>, %arg7: memref<1x8x1xf32, #tpu.memory_space<vmem>>) attributes {dimension_semantics = [#tpu.dimension_semantics<parallel>], iteration_bounds = array<i64: 2>, scalar_prefetch = 0 : i64, scratch_operands = 0 : i64, tpu.core_type = #tpu.core_type<tc>, window_params = [{transform_indices = @transform_0, window_bounds = array<i64: 1, 8, 32>}, {transform_indices = @transform_1, window_bounds = array<i64: 1, 1, 32>}, {transform_indices = @transform_2, window_bounds = array<i64: 1, 8, 1>}, {pipeline_mode = #tpu.pipeline_mode<synchronous>, transform_indices = @transform_3, window_bounds = array<i64: 32, 32>}, {pipeline_mode = #tpu.pipeline_mode<synchronous>, transform_indices = @transform_4, window_bounds = array<i64: 1, 1, 32>}, {transform_indices = @transform_5, window_bounds = array<i64: 1, 8, 32>}, {transform_indices = @transform_6, window_bounds = array<i64: 1, 8, 1>}]} {
    %c0 = arith.constant 0 : index
    %c0_0 = arith.constant 0 : index
    %c0_1 = arith.constant 0 : index
    %0 = vector.load %arg1[%c0, %c0_0, %c0_1] : memref<1x8x32xf32, #tpu.memory_space<vmem>>, vector<1x8x32xf32>
    %1 = vector.shape_cast %0 : vector<1x8x32xf32> to vector<8x32xf32>
    %c0_2 = arith.constant 0 : index
    %c0_3 = arith.constant 0 : index
    %2 = vector.load %arg4[%c0_2, %c0_3] : memref<32x32xf32, #tpu.memory_space<vmem>>, vector<32x32xf32>
    %cst = arith.constant dense<0.000000e+00> : vector<8x32xf32>
    %3 = tpu.matmul %1, %2, %cst {dimension_numbers = #tpu.dot_dimension_numbers<[1], [0], [0], [1], [0, 0, 1, 1], [], []>} : vector<8x32xf32>, vector<32x32xf32>, vector<8x32xf32> -> vector<8x32xf32>
    %4 = vector.shape_cast %3 : vector<8x32xf32> to vector<1x8x32xf32>
    %c0_4 = arith.constant 0 : index
    %c0_5 = arith.constant 0 : index
    %c0_6 = arith.constant 0 : index
    %5 = vector.load %arg2[%c0_4, %c0_5, %c0_6] : memref<1x1x32xf32, #tpu.memory_space<vmem>>, vector<1x1x32xf32>
    %6 = vector.broadcast %5 : vector<1x1x32xf32> to vector<1x8x32xf32>
    %7 = arith.addf %4, %6 : vector<1x8x32xf32>
    %8 = math.tanh %7 : vector<1x8x32xf32>
    %c0_7 = arith.constant 0 : index
    %c0_8 = arith.constant 0 : index
    %c0_9 = arith.constant 0 : index
    %9 = vector.load %arg5[%c0_7, %c0_8, %c0_9] : memref<1x1x32xf32, #tpu.memory_space<vmem>>, vector<1x1x32xf32>
    %10 = vector.broadcast %9 : vector<1x1x32xf32> to vector<1x8x32xf32>
    %11 = arith.mulf %8, %10 : vector<1x8x32xf32>
    %cst_10 = arith.constant dense<0.000000e+00> : vector<1x8xf32>
    %12 = vector.multi_reduction <add>, %11, %cst_10 [2] : vector<1x8x32xf32> to vector<1x8xf32>
    %13 = vector.shape_cast %12 : vector<1x8xf32> to vector<1x8x1xf32>
    %c0_11 = arith.constant 0 : index
    %c0_12 = arith.constant 0 : index
    %c0_13 = arith.constant 0 : index
    %14 = vector.load %arg3[%c0_11, %c0_12, %c0_13] : memref<1x8x1xf32, #tpu.memory_space<vmem>>, vector<1x8x1xf32>
    %cst_14 = arith.constant 5.000000e-01 : f32
    %15 = vector.broadcast %cst_14 : f32 to vector<1x8x1xf32>
    %16 = arith.cmpf ogt, %14, %15 : vector<1x8x1xf32>
    %cst_15 = arith.constant -1.000000e+09 : f32
    %17 = vector.broadcast %cst_15 : f32 to vector<1x8x1xf32>
    %18 = arith.select %16, %13, %17 : vector<1x8x1xi1>, vector<1x8x1xf32>
    %cst_16 = arith.constant dense<0xFF800000> : vector<1x1xf32>
    %19 = vector.multi_reduction <maximumf>, %18, %cst_16 [1] : vector<1x8x1xf32> to vector<1x1xf32>
    %20 = vector.shape_cast %19 : vector<1x1xf32> to vector<1x1x1xf32>
    %21 = vector.broadcast %20 : vector<1x1x1xf32> to vector<1x8x1xf32>
    %22 = arith.subf %18, %21 : vector<1x8x1xf32>
    %23 = math.exp %22 : vector<1x8x1xf32>
    %cst_17 = arith.constant dense<0.000000e+00> : vector<1x1xf32>
    %24 = vector.multi_reduction <add>, %23, %cst_17 [1] : vector<1x8x1xf32> to vector<1x1xf32>
    %25 = vector.shape_cast %24 : vector<1x1xf32> to vector<1x1x1xf32>
    %26 = tpu.reciprocal %25 {approx = true} : vector<1x1x1xf32> -> vector<1x1x1xf32>
    %27 = vector.broadcast %26 : vector<1x1x1xf32> to vector<1x8x1xf32>
    %28 = arith.mulf %23, %27 : vector<1x8x1xf32>
    %c0_18 = arith.constant 0 : index
    %c0_19 = arith.constant 0 : index
    %c0_20 = arith.constant 0 : index
    %29 = vector.load %arg7[%c0_18, %c0_19, %c0_20] : memref<1x8x1xf32, #tpu.memory_space<vmem>>, vector<1x8x1xf32>
    tpu.vector_store %arg7[%c0_18, %c0_19, %c0_20], %28 {strides = array<i32>} : memref<1x8x1xf32, #tpu.memory_space<vmem>>, vector<1x8x1xf32>,
    %30 = vector.broadcast %28 : vector<1x8x1xf32> to vector<1x8x32xf32>
    %31 = arith.mulf %0, %30 : vector<1x8x32xf32>
    %c0_21 = arith.constant 0 : index
    %c0_22 = arith.constant 0 : index
    %c0_23 = arith.constant 0 : index
    %32 = vector.load %arg6[%c0_21, %c0_22, %c0_23] : memref<1x8x32xf32, #tpu.memory_space<vmem>>, vector<1x8x32xf32>
    tpu.vector_store %arg6[%c0_21, %c0_22, %c0_23], %31 {strides = array<i32>} : memref<1x8x32xf32, #tpu.memory_space<vmem>>, vector<1x8x32xf32>,
    return
  }
  func.func @transform_0(%arg0: i32) -> (i32, i32, i32) {
    %c0_i32 = arith.constant 0 : i32
    %c0_i32_0 = arith.constant 0 : i32
    %c0_i32_1 = arith.constant 0 : i32
    return %arg0, %c0_i32, %c0_i32_0 : i32, i32, i32
  }
  func.func @transform_1(%arg0: i32) -> (i32, i32, i32) {
    %c0_i32 = arith.constant 0 : i32
    %c0_i32_0 = arith.constant 0 : i32
    %c0_i32_1 = arith.constant 0 : i32
    return %arg0, %c0_i32, %c0_i32_0 : i32, i32, i32
  }
  func.func @transform_2(%arg0: i32) -> (i32, i32, i32) {
    %c0_i32 = arith.constant 0 : i32
    %c0_i32_0 = arith.constant 0 : i32
    %c0_i32_1 = arith.constant 0 : i32
    return %arg0, %c0_i32, %c0_i32_0 : i32, i32, i32
  }
  func.func @transform_3(%arg0: i32) -> (i32, i32) {
    %c0_i32 = arith.constant 0 : i32
    %c0_i32_0 = arith.constant 0 : i32
    %c0_i32_1 = arith.constant 0 : i32
    return %c0_i32, %c0_i32_0 : i32, i32
  }
  func.func @transform_4(%arg0: i32) -> (i32, i32, i32) {
    %c0_i32 = arith.constant 0 : i32
    %c0_i32_0 = arith.constant 0 : i32
    %c0_i32_1 = arith.constant 0 : i32
    %c0_i32_2 = arith.constant 0 : i32
    return %c0_i32, %c0_i32_0, %c0_i32_1 : i32, i32, i32
  }
  func.func @transform_5(%arg0: i32) -> (i32, i32, i32) {
    %c0_i32 = arith.constant 0 : i32
    %c0_i32_0 = arith.constant 0 : i32
    %c0_i32_1 = arith.constant 0 : i32
    return %arg0, %c0_i32, %c0_i32_0 : i32, i32, i32
  }
  func.func @transform_6(%arg0: i32) -> (i32, i32, i32) {
    %c0_i32 = arith.constant 0 : i32
    %c0_i32_0 = arith.constant 0 : i32
    %c0_i32_1 = arith.constant 0 : i32
    return %arg0, %c0_i32, %c0_i32_0 : i32, i32, i32
  }
}

</mosaic_0001>

<bundles_post_ra>
// kernel: tpu_custom_call.1
= control target key start
LH: loop header
LB: loop body
LE: loop exit
PB: predicated region body
PF: predicated region fallthrough
CT: control target
= control target key end

     0   :  { %12 = vsyncpa [#allocation3], 0  ;;  %s928_s0 = inlined_call_operand.vmem [shape: f32[2,8,32], index: 0, kind: input, shape index: {}]   ;;  %s929_s1 = inlined_call_operand.vmem [shape: f32[2,1,32], index: 1, kind: input, shape index: {}]   ;;  %s930_s2 = inlined_call_operand.vmem [shape: f32[2,8,1], index: 2, kind: input, shape index: {}]   ;;  %s931_s3 = inlined_call_operand.hbm [shape: f32[32,32], index: 3, kind: input, shape index: {}]   ;;  %s932_s4 = inlined_call_operand.vmem [shape: f32[1,1,32], index: 4, kind: input, shape index: {}]   ;;  %s933_s5 = inlined_call_operand.hbm [shape: f32[2,8,32], index: 5, kind: output, shape index: {0}]   ;;  %s934_s6 = inlined_call_operand.vmem [shape: f32[2,8,1], index: 6, kind: output, shape index: {1}]  }
   0x1   :  { %13 = vsyncpa [#allocation4], 0 }
   0x2   :  { %15 = vsyncpa [#allocation4 + $0x1], 0  ;;  %s800_s21 = smov 0   ;;  %s802_s22 = smov 0  }
   0x3   :  { %s804_s23 = smov 0   ;;  %s806_s24 = smov 0  }
   0x4 LB: > { %s821_s25 = sadd.s32 4294967295, %s756_s24   ;;  %s571_s26 = sadd.s32 4294967294, %s756_s24   ;;  %s756_s24 = sphi %s806_s24, %s942_s24   ;;  %s752_s23 = sphi %s804_s23, %s941_s23   ;;  %s748_s22 = sphi %s802_s22, %s940_s22   ;;  %s744_s21 = sphi %s800_s21, %s939_s21  }
   0x5   : > { %s825_s27 = sadd.s32 1, %s756_s24   ;;  %s148_s28 = sadd.s32 1, %s752_s23 }
   0x6   : > { %s145_s29 = ssub.s32 %s756_s24, %s825_s27  ;;  %p158_p0 = scmp.ne.s32.totalorder %s752_s23, %s748_s22 }
   0x7   : > { %p146_p1 = scmp.eq.s32.totalorder %s145_s29, 0  ;;  %p159_p2 = scmp.eq.s32.totalorder %s821_s25, 1 }
   0x8   : > { %p164_p3 = scmp.ne.s32.totalorder %s748_s22, %s744_s21  ;;  %p165_p4 = scmp.eq.s32.totalorder %s571_s26, 1 }
   0x9   : > { %s836_s30 = scalar_select %p146_p1, %s752_s23, %s148_s28  }
   0xa   : > { %p838_p5 = por %p159_p2, %p158_p0  ;;  %p842_p6 = por %p165_p4, %p164_p3 }
   0xb   : > { %p572_p7 = scmp.ge.s32.totalorder %s756_s24, 1  ;;  %p198_p8 = scmp.lt.s32.totalorder %s756_s24, 3 }
   0xc   : > { %s936_s8 = scalar_select %p842_p6, 1, 0 }
   0xd   : > { %p618_p9 = scmp.eq.s32.totalorder %s821_s25, 0  ;;  %p849_p10 = pnand %p572_p7, %p198_p8 }
   0xe   : > { %s758_s10 = smov [#allocation2]  }
   0xf   : > { %s210_s11 = sshll.u32 %s758_s10, 4  ;;  %p610_p11 = pneg %p849_p10  ;;  %s211_s11 = int_to_ptr.vmem [resolvable:$true] %s210_s11 }
  0x10   : > { %s677_s12 = scalar_lea.vmem %s211_s11, 512  ;;  %p685_p3 = scmp.lt.s32.totalorder %s211_s11, %s211_s11 }
  0x11   : > { %p611_p12 = pnand %p618_p9, %p610_p11  ;;  %p678_p0 = scmp.ne.s32.totalorder %s211_s11, %s677_s12 }
  0x12   : > { %p686_p4 = scmp.lt.s32.totalorder %s677_s12, %s677_s12 }
  0x13   : > { %p668_p13 = pneg %p611_p12 }
  0x14   : > { %p687_p6 = por %p686_p4, %p685_p3 }
  0x15   : > { %p680_p1 = pnand %p678_p0, %p668_p13 }
  0x17   : > { %p681_p2 = pneg %p680_p1 }
  0x19   : > { %p688_p7 = pnand %p687_p6, %p681_p2 }
  0x1b   : > { %691 = shalt.err (!%p688_p7)
}
  0x1c   : > { %s759_s13 = smov 128   ;;  %s760_s14 = smov 8  }
  0x1d   : > { %613 = dma.hbm_to_vmem [thread:$0]  (!%p611_p12), %s931_s3, 512, %s211_s11, [#allocation3], %s759_s13, %s759_s13, %s760_s14  }
  0x1e   : > { %249 = sbr.rel (%p849_p10) target bundleno = 595 (0x253), region = 40 }
  0x23   : > { %735 = dma.done.wait (%p618_p9), [#allocation3], 512  }
  0x24   : > { %737 = vsyncadd (%p618_p9), [#allocation3], 4294966784  ;;  %p289_p8 = scmp.lt.s32.totalorder %s821_s25, 1  ;;  %v761_v0 = vmov 0.0   ;;  %vm762_vm0 = vmmov 0   ;;  %v308_v1 = vld [vmem:[#allocation2 + $0x18] sm:$0xff] }
  0x25   : > { %593 = vmatprep.subr.mxu0 %v761_v0  ;;  %601 = vmatprep.mubr.msk.f32.mxu0 %vm762_vm0, %v761_v0  ;;  %v307_v2 = vld [vmem:[#allocation2 + $0x10] sm:$0xff]  ;;  %v306_v3 = vld [vmem:[#allocation2 + $0x8] sm:$0xff]  ;;  %v305_v4 = vld [vmem:[#allocation2] sm:$0xff]  ;;  %vm309_vm1 = vcmask 261120   ;;  %v763_v14 = vmov 0   ;;  %vm406_vm3 = vcmask 7168  }
  0x26   : > { %s290_s17 = scalar_select %p289_p8, %s821_s25, 1  ;;  %594 = vmatpush3.msra.mxu0 %v308_v1  ;;  %v583_v10 = vld [vmem:[%s932_s4] ss:$0 sm:$0xff]  ;;  %659 = vset.pattern.permute.xlu0 %v763_v14 }
  0x27   : > { %595 = vmatprep.subr.mxu0 %v761_v0  ;;  %s280_s19 = sand.u32 1, %s748_s22   ;;  %s764_s13 = smov [#allocation5]  }
  0x28   : > { %s868_s18 = sshll.u32 %s290_s17, 3  ;;  %596 = vmatpush3.msra.mxu0 %v307_v2  ;;  %s295_s9 = scalar_lea.vmem %s929_s1, %s290_s17 }
  0x29   : > { %s292_s26 = scalar_lea.vmem %s928_s0, %s868_s18  ;;  %597 = vmatprep.subr.mxu0 %v761_v0  ;;  %v582_v6 = vld [vmem:[%s295_s9] ss:$0 sm:$0xff]  ;;  %s299_s14 = scalar_lea.vmem %s930_s2, %s868_s18 }
  0x2a   : > { %598 = vmatpush3.msra.mxu0 %v306_v3  ;;  %v304_v5 = vld [vmem:[%s292_s26] sm:$0xff]  ;;  %s303_s17 = scalar_lea.vmem %s934_s6, %s868_s18  ;;  %s577_s20 = sshll.u32 %s280_s19, 3 }
  0x2b   : > { %599 = vmatprep.subr.mxu0 %v761_v0  ;;  %v403_v15 = vld [vmem:[%s299_s14] sm:$0xff]  ;;  %s585_s26 = sshll.u32 %s821_s25, 7  ;;  %s282_s28 = scalar_lea.vmem [#allocation5], %s577_s20 }
  0x2c   : > { %600 = vmatpush3.msra.mxu0 %v305_v4  ;;  %vm404_vm2 = vcmp.gt.f32.partialorder %v403_v15, 0.5  ;;  %s452_s29 = sshll.u32 %s282_s28, 4  ;;  %s450_s11 = scalar_lea.hbm %s933_s5, %s585_s26  ;;  %s453_s29 = int_to_ptr.vmem [resolvable:$true] %s452_s29 }
  0x2d   : > { %602 = vmatmul.mubr.msk.f32.vlgmr.msra.gmra.mxu0 %vm309_vm1, %v304_v5  ;;  %s435_s18 = scalar_lea.sflag [#allocation4], %s280_s19  ;;  %s692_s12 = scalar_lea.vmem %s453_s29, 128 }
  0x2e   : > { %p693_p6 = scmp.ne.s32.totalorder %s453_s29, %s692_s12  ;;  %s696_s14 = sshll.u32 %s764_s13, 4  ;;  %s697_s14 = int_to_ptr.vmem [resolvable:$false] %s696_s14 }
  0x2f   : > { %s698_s25 = scalar_lea.vmem %s697_s14, 256  ;;  %p699_p11 = scmp.lt.s32.totalorder %s453_s29, %s697_s14 }
  0x30   : > { %p694_p9 = pnand %p693_p6, %p838_p5  ;;  %p700_p12 = scmp.lt.s32.totalorder %s698_s25, %s692_s12 }
  0x32   : > { %p695_p10 = pneg %p694_p9  ;;  %p701_p13 = por %p700_p12, %p699_p11 }
  0x34   : > { %p702_p0 = pnand %p701_p13, %p695_p10 }
  0xed   : > { %v379_v7 = vpop.f32.mrf.mxu0 }
  0xee   : > { %v390_v8 = vadd.f32 %v582_v6, %v379_v7 }
  0xef   : > { %v603_v9 = vpop.f32.mrf.mxu0 }
  0xf0   : > { %660 = vtanh.f32 %v390_v8 }
  0xfd   : > { %v661_v11 = vpop.eup %660 }
  0xfe   : > { %v399_v12 = vmul.f32 %v661_v11, %v583_v10 }
 0x100   : > { %v400_v13 = vsel %vm309_vm1, %v399_v12, 0.0 }
 0x101   : > { %401 = vadd.xlane.f32.xlu0 %v400_v13 }
 0x18a   : > { %v402_v16 = vpop.xlane.xlu0 %401 }
 0x18b   : > { %v405_v17 = vsel %vm404_vm2, %v402_v16, -1e+09 }
 0x18c   : > { %v407_v18 = vsel %vm406_vm3, %v405_v17, -inf }
 0x18d   : > { %v408_v19 = vrot.slane %v407_v18, 4 }
 0x18f   : > { %v409_v20 = vmax.f32 %v407_v18, %v408_v19 }
 0x191   : > { %v410_v21 = vrot.slane %v409_v20, 2 }
 0x193   : > { %v411_v22 = vmax.f32 %v409_v20, %v410_v21 }
 0x195   : > { %v412_v23 = vrot.slane %v411_v22, 1 }
 0x197   : > { %v413_v24 = vmax.f32 %v411_v22, %v412_v23 }
 0x199   : > { %v414_v25 = vsub.f32 %v405_v17, %v413_v24 }
 0x19b   : > { %v415_v26 = vmul.f32 1.442695, %v414_v25 }
 0x19d   : > { %662 = vpow2.f32 %v415_v26 }
 0x1aa   : > { %v663_v27 = vpop.eup %662 }
 0x1ab   : > { %v417_v28 = vsel %vm406_vm3, %v663_v27, 0.0 }
 0x1ac   : > { %v418_v29 = vrot.slane %v417_v28, 4 }
 0x1ae   : > { %v419_v30 = vadd.f32 %v418_v29, %v417_v28 }
 0x1b0   : > { %v420_v31 = vrot.slane %v419_v30, 2 }
 0x1b2   : > { %v421_v32 = vadd.f32 %v420_v31, %v419_v30 }
 0x1b4   : > { %v422_v33 = vrot.slane %v421_v32, 1 }
 0x1b6   : > { %v423_v34 = vadd.f32 %v422_v33, %v421_v32 }
 0x1b8   : > { %664 = vrcp.f32 %v423_v34 }
 0x1c5   : > { %v665_v35 = vpop.eup %664 }
 0x1c6   : > { %v425_v36 = vmul.f32 %v665_v35, %v663_v27 }
 0x1c8   : > { %429 = vperm.xlu0 %659, %v425_v36   ;;  %426 = vst.msk [vmem:[%s303_s17] sm:$0xff] %vm406_vm3, %v425_v36 }
 0x243   : > { %v430_v37 = vpop.permute.xlu0 %429 }
 0x244   : > { %v432_v38 = vmul.f32 %v430_v37, %v304_v5 }
 0x246   : > { %433 = vst.msk [vmem:[%s282_s28] sm:$0xff] %vm309_vm1, %v432_v38 }
 0x247   : > { %705 = shalt.err (!%p702_p0)
}
 0x248   : > { %s706_s15 = scalar_lea.hbm %s450_s11, 128  ;;  %s710_s19 = scalar_lea.hbm %s933_s5, 256 }
 0x249   : > { %p707_p1 = scmp.ne.s32.totalorder %s450_s11, %s706_s15  ;;  %p711_p4 = scmp.lt.s32.totalorder %s450_s11, %s933_s5 }
 0x24a   : > { %p712_p7 = scmp.lt.s32.totalorder %s710_s19, %s706_s15 }
 0x24b   : > { %p708_p2 = pnand %p707_p1, %p838_p5 }
 0x24c   : > { %p713_p8 = por %p712_p7, %p711_p4 }
 0x24d   : > { %p709_p3 = pneg %p708_p2 }
 0x24f   : > { %p714_p6 = pnand %p713_p8, %p709_p3 }
 0x251   : > { %717 = shalt.err (!%p714_p6)
}
 0x252   : > { %608 = dma.vmem_to_hbm [thread:$0]  (%p838_p5), %s453_s29, 128, %s450_s11, %s435_s18  }
 0x253 PF: > { %p620_p9 = scmp.ge.s32.totalorder %s756_s24, 2  ;;  %s467_s28 = sand.u32 1, %s744_s21  }
 0x254   : > { %p938_p10 = scmp.ne.s32.totalorder %s936_s8, 0  ;;  %s468_s9 = scalar_lea.sflag [#allocation4], %s467_s28 }
 0x256   : > { %p615_p11 = pnand %p620_p9, %p938_p10 }
 0x258   : > { %p616_p12 = pneg %p615_p11 }
 0x25a   : > { %739 = dma.done.wait (%p616_p12), %s468_s9, 128  }
 0x25b   : > { %741 = vsyncadd (%p616_p12), %s468_s9, 4294967168  ;;  %p18_p13 = scmp.ge.s32.totalorder %s825_s27, 4   ;;  %s939_s21 = smov %s748_s22 }
 0x25c   : > { %s940_s22 = smov %s752_s23  ;;  %s941_s23 = smov %s836_s30 }
 0x25d   : > { %s942_s24 = smov %s825_s27  ;;  %20 = sbr.rel (!%p18_p13) target bundleno = 4 (0x4), region = 98 }
 0x262   :  { %480 = vsyncpa [#allocation3], 1 }
 0x263   :  { %482 = vsyncpa [#allocation3 + $0x1], 1 }
 0x264   :  { %483 = vsyncpa [#allocation4], 1 }
 0x265   :  { %485 = vsyncpa [#allocation4 + $0x1], 1 }

// kernel: tpu_custom_call.1
= control target key start
LH: loop header
LB: loop body
LE: loop exit
PB: predicated region body
PF: predicated region fallthrough
CT: control target
= control target key end

     0   :  { %12 = vsyncpa [#allocation3], 0  ;;  %s928_s0 = inlined_call_operand.vmem [shape: f32[2,8,32], index: 0, kind: input, shape index: {}]   ;;  %s929_s1 = inlined_call_operand.vmem [shape: f32[2,1,32], index: 1, kind: input, shape index: {}]   ;;  %s930_s2 = inlined_call_operand.vmem [shape: f32[2,8,1], index: 2, kind: input, shape index: {}]   ;;  %s931_s3 = inlined_call_operand.hbm [shape: f32[32,32], index: 3, kind: input, shape index: {}]   ;;  %s932_s4 = inlined_call_operand.vmem [shape: f32[1,1,32], index: 4, kind: input, shape index: {}]   ;;  %s933_s5 = inlined_call_operand.hbm [shape: f32[2,8,32], index: 5, kind: output, shape index: {0}]   ;;  %s934_s6 = inlined_call_operand.vmem [shape: f32[2,8,1], index: 6, kind: output, shape index: {1}]  }
   0x1   :  { %13 = vsyncpa [#allocation4], 0 }
   0x2   :  { %15 = vsyncpa [#allocation4 + $0x1], 0  ;;  %s800_s21 = smov 0   ;;  %s802_s22 = smov 0  }
   0x3   :  { %s804_s23 = smov 0   ;;  %s806_s24 = smov 0  }
   0x4 LB: > { %s821_s25 = sadd.s32 4294967295, %s756_s24   ;;  %s571_s26 = sadd.s32 4294967294, %s756_s24   ;;  %s756_s24 = sphi %s806_s24, %s942_s24   ;;  %s752_s23 = sphi %s804_s23, %s941_s23   ;;  %s748_s22 = sphi %s802_s22, %s940_s22   ;;  %s744_s21 = sphi %s800_s21, %s939_s21  }
   0x5   : > { %s825_s27 = sadd.s32 1, %s756_s24   ;;  %s148_s28 = sadd.s32 1, %s752_s23 }
   0x6   : > { %s145_s29 = ssub.s32 %s756_s24, %s825_s27  ;;  %p158_p0 = scmp.ne.s32.totalorder %s752_s23, %s748_s22 }
   0x7   : > { %p146_p1 = scmp.eq.s32.totalorder %s145_s29, 0  ;;  %p159_p2 = scmp.eq.s32.totalorder %s821_s25, 1 }
   0x8   : > { %p164_p3 = scmp.ne.s32.totalorder %s748_s22, %s744_s21  ;;  %p165_p4 = scmp.eq.s32.totalorder %s571_s26, 1 }
   0x9   : > { %s836_s30 = scalar_select %p146_p1, %s752_s23, %s148_s28  }
   0xa   : > { %p838_p5 = por %p159_p2, %p158_p0  ;;  %p842_p6 = por %p165_p4, %p164_p3 }
   0xb   : > { %p572_p7 = scmp.ge.s32.totalorder %s756_s24, 1  ;;  %p198_p8 = scmp.lt.s32.totalorder %s756_s24, 3 }
   0xc   : > { %s936_s8 = scalar_select %p842_p6, 1, 0 }
   0xd   : > { %p618_p9 = scmp.eq.s32.totalorder %s821_s25, 0  ;;  %p849_p10 = pnand %p572_p7, %p198_p8 }
   0xe   : > { %s758_s10 = smov [#allocation2]  }
   0xf   : > { %s210_s11 = sshll.u32 %s758_s10, 4  ;;  %p610_p11 = pneg %p849_p10  ;;  %s211_s11 = int_to_ptr.vmem [resolvable:$true] %s210_s11 }
  0x10   : > { %s677_s12 = scalar_lea.vmem %s211_s11, 512  ;;  %p685_p3 = scmp.lt.s32.totalorder %s211_s11, %s211_s11 }
  0x11   : > { %p611_p12 = pnand %p618_p9, %p610_p11  ;;  %p678_p0 = scmp.ne.s32.totalorder %s211_s11, %s677_s12 }
  0x12   : > { %p686_p4 = scmp.lt.s32.totalorder %s677_s12, %s677_s12 }
  0x13   : > { %p668_p13 = pneg %p611_p12 }
  0x14   : > { %p687_p6 = por %p686_p4, %p685_p3 }
  0x15   : > { %p680_p1 = pnand %p678_p0, %p668_p13 }
  0x17   : > { %p681_p2 = pneg %p680_p1 }
  0x19   : > { %p688_p7 = pnand %p687_p6, %p681_p2 }
  0x1b   : > { %691 = shalt.err (!%p688_p7)
}
  0x1c   : > { %s759_s13 = smov 128   ;;  %s760_s14 = smov 8  }
  0x1d   : > { %613 = dma.hbm_to_vmem [thread:$0]  (!%p611_p12), %s931_s3, 512, %s211_s11, [#allocation3], %s759_s13, %s759_s13, %s760_s14  }
  0x1e   : > { %249 = sbr.rel (%p849_p10) target bundleno = 595 (0x253), region = 40 }
  0x23   : > { %735 = dma.done.wait (%p618_p9), [#allocation3], 512  }
  0x24   : > { %737 = vsyncadd (%p618_p9), [#allocation3], 4294966784  ;;  %p289_p8 = scmp.lt.s32.totalorder %s821_s25, 1  ;;  %v761_v0 = vmov 0.0   ;;  %vm762_vm0 = vmmov 0   ;;  %v308_v1 = vld [vmem:[#allocation2 + $0x18] sm:$0xff] }
  0x25   : > { %593 = vmatprep.subr.mxu0 %v761_v0  ;;  %601 = vmatprep.mubr.msk.f32.mxu0 %vm762_vm0, %v761_v0  ;;  %v307_v2 = vld [vmem:[#allocation2 + $0x10] sm:$0xff]  ;;  %v306_v3 = vld [vmem:[#allocation2 + $0x8] sm:$0xff]  ;;  %v305_v4 = vld [vmem:[#allocation2] sm:$0xff]  ;;  %vm309_vm1 = vcmask 261120   ;;  %v763_v14 = vmov 0   ;;  %vm406_vm3 = vcmask 7168  }
  0x26   : > { %s290_s17 = scalar_select %p289_p8, %s821_s25, 1  ;;  %594 = vmatpush3.msra.mxu0 %v308_v1  ;;  %v583_v10 = vld [vmem:[%s932_s4] ss:$0 sm:$0xff]  ;;  %659 = vset.pattern.permute.xlu0 %v763_v14 }
  0x27   : > { %595 = vmatprep.subr.mxu0 %v761_v0  ;;  %s280_s19 = sand.u32 1, %s748_s22   ;;  %s764_s13 = smov [#allocation5]  }
  0x28   : > { %s868_s18 = sshll.u32 %s290_s17, 3  ;;  %596 = vmatpush3.msra.mxu0 %v307_v2  ;;  %s295_s9 = scalar_lea.vmem %s929_s1, %s290_s17 }
  0x29   : > { %s292_s26 = scalar_lea.vmem %s928_s0, %s868_s18  ;;  %597 = vmatprep.subr.mxu0 %v761_v0  ;;  %v582_v6 = vld [vmem:[%s295_s9] ss:$0 sm:$0xff]  ;;  %s299_s14 = scalar_lea.vmem %s930_s2, %s868_s18 }
  0x2a   : > { %598 = vmatpush3.msra.mxu0 %v306_v3  ;;  %v304_v5 = vld [vmem:[%s292_s26] sm:$0xff]  ;;  %s303_s17 = scalar_lea.vmem %s934_s6, %s868_s18  ;;  %s577_s20 = sshll.u32 %s280_s19, 3 }
  0x2b   : > { %599 = vmatprep.subr.mxu0 %v761_v0  ;;  %v403_v15 = vld [vmem:[%s299_s14] sm:$0xff]  ;;  %s585_s26 = sshll.u32 %s821_s25, 7  ;;  %s282_s28 = scalar_lea.vmem [#allocation5], %s577_s20 }
  0x2c   : > { %600 = vmatpush3.msra.mxu0 %v305_v4  ;;  %vm404_vm2 = vcmp.gt.f32.partialorder %v403_v15, 0.5  ;;  %s452_s29 = sshll.u32 %s282_s28, 4  ;;  %s450_s11 = scalar_lea.hbm %s933_s5, %s585_s26  ;;  %s453_s29 = int_to_ptr.vmem [resolvable:$true] %s452_s29 }
  0x2d   : > { %602 = vmatmul.mubr.msk.f32.vlgmr.msra.gmra.mxu0 %vm309_vm1, %v304_v5  ;;  %s435_s18 = scalar_lea.sflag [#allocation4], %s280_s19  ;;  %s692_s12 = scalar_lea.vmem %s453_s29, 128 }
  0x2e   : > { %p693_p6 = scmp.ne.s32.totalorder %s453_s29, %s692_s12  ;;  %s696_s14 = sshll.u32 %s764_s13, 4  ;;  %s697_s14 = int_to_ptr.vmem [resolvable:$false] %s696_s14 }
  0x2f   : > { %s698_s25 = scalar_lea.vmem %s697_s14, 256  ;;  %p699_p11 = scmp.lt.s32.totalorder %s453_s29, %s697_s14 }
  0x30   : > { %p694_p9 = pnand %p693_p6, %p838_p5  ;;  %p700_p12 = scmp.lt.s32.totalorder %s698_s25, %s692_s12 }
  0x32   : > { %p695_p10 = pneg %p694_p9  ;;  %p701_p13 = por %p700_p12, %p699_p11 }
  0x34   : > { %p702_p0 = pnand %p701_p13, %p695_p10 }
  0xed   : > { %v379_v7 = vpop.f32.mrf.mxu0 }
  0xee   : > { %v390_v8 = vadd.f32 %v582_v6, %v379_v7 }
  0xef   : > { %v603_v9 = vpop.f32.mrf.mxu0 }
  0xf0   : > { %660 = vtanh.f32 %v390_v8 }
  0xfd   : > { %v661_v11 = vpop.eup %660 }
  0xfe   : > { %v399_v12 = vmul.f32 %v661_v11, %v583_v10 }
 0x100   : > { %v400_v13 = vsel %vm309_vm1, %v399_v12, 0.0 }
 0x101   : > { %401 = vadd.xlane.f32.xlu0 %v400_v13 }
 0x18a   : > { %v402_v16 = vpop.xlane.xlu0 %401 }
 0x18b   : > { %v405_v17 = vsel %vm404_vm2, %v402_v16, -1e+09 }
 0x18c   : > { %v407_v18 = vsel %vm406_vm3, %v405_v17, -inf }
 0x18d   : > { %v408_v19 = vrot.slane %v407_v18, 4 }
 0x18f   : > { %v409_v20 = vmax.f32 %v407_v18, %v408_v19 }
 0x191   : > { %v410_v21 = vrot.slane %v409_v20, 2 }
 0x193   : > { %v411_v22 = vmax.f32 %v409_v20, %v410_v21 }
 0x195   : > { %v412_v23 = vrot.slane %v411_v22, 1 }
 0x197   : > { %v413_v24 = vmax.f32 %v411_v22, %v412_v23 }
 0x199   : > { %v414_v25 = vsub.f32 %v405_v17, %v413_v24 }
 0x19b   : > { %v415_v26 = vmul.f32 1.442695, %v414_v25 }
 0x19d   : > { %662 = vpow2.f32 %v415_v26 }
 0x1aa   : > { %v663_v27 = vpop.eup %662 }
 0x1ab   : > { %v417_v28 = vsel %vm406_vm3, %v663_v27, 0.0 }
 0x1ac   : > { %v418_v29 = vrot.slane %v417_v28, 4 }
 0x1ae   : > { %v419_v30 = vadd.f32 %v418_v29, %v417_v28 }
 0x1b0   : > { %v420_v31 = vrot.slane %v419_v30, 2 }
 0x1b2   : > { %v421_v32 = vadd.f32 %v420_v31, %v419_v30 }
 0x1b4   : > { %v422_v33 = vrot.slane %v421_v32, 1 }
 0x1b6   : > { %v423_v34 = vadd.f32 %v422_v33, %v421_v32 }
 0x1b8   : > { %664 = vrcp.f32 %v423_v34 }
 0x1c5   : > { %v665_v35 = vpop.eup %664 }
 0x1c6   : > { %v425_v36 = vmul.f32 %v665_v35, %v663_v27 }
 0x1c8   : > { %429 = vperm.xlu0 %659, %v425_v36   ;;  %426 = vst.msk [vmem:[%s303_s17] sm:$0xff] %vm406_vm3, %v425_v36 }
 0x243   : > { %v430_v37 = vpop.permute.xlu0 %429 }
 0x244   : > { %v432_v38 = vmul.f32 %v430_v37, %v304_v5 }
 0x246   : > { %433 = vst.msk [vmem:[%s282_s28] sm:$0xff] %vm309_vm1, %v432_v38 }
 0x247   : > { %705 = shalt.err (!%p702_p0)
}
 0x248   : > { %s706_s15 = scalar_lea.hbm %s450_s11, 128  ;;  %s710_s19 = scalar_lea.hbm %s933_s5, 256 }
 0x249   : > { %p707_p1 = scmp.ne.s32.totalorder %s450_s11, %s706_s15  ;;  %p711_p4 = scmp.lt.s32.totalorder %s450_s11, %s933_s5 }
 0x24a   : > { %p712_p7 = scmp.lt.s32.totalorder %s710_s19, %s706_s15 }
 0x24b   : > { %p708_p2 = pnand %p707_p1, %p838_p5 }
 0x24c   : > { %p713_p8 = por %p712_p7, %p711_p4 }
 0x24d   : > { %p709_p3 = pneg %p708_p2 }
 0x24f   : > { %p714_p6 = pnand %p713_p8, %p709_p3 }
 0x251   : > { %717 = shalt.err (!%p714_p6)
}
 0x252   : > { %608 = dma.vmem_to_hbm [thread:$0]  (%p838_p5), %s453_s29, 128, %s450_s11, %s435_s18  }
 0x253 PF: > { %p620_p9 = scmp.ge.s32.totalorder %s756_s24, 2  ;;  %s467_s28 = sand.u32 1, %s744_s21  }
 0x254   : > { %p938_p10 = scmp.ne.s32.totalorder %s936_s8, 0  ;;  %s468_s9 = scalar_lea.sflag [#allocation4], %s467_s28 }
 0x256   : > { %p615_p11 = pnand %p620_p9, %p938_p10 }
 0x258   : > { %p616_p12 = pneg %p615_p11 }
 0x25a   : > { %739 = dma.done.wait (%p616_p12), %s468_s9, 128  }
 0x25b   : > { %741 = vsyncadd (%p616_p12), %s468_s9, 4294967168  ;;  %p18_p13 = scmp.ge.s32.totalorder %s825_s27, 4   ;;  %s939_s21 = smov %s748_s22 }
 0x25c   : > { %s940_s22 = smov %s752_s23  ;;  %s941_s23 = smov %s836_s30 }
 0x25d   : > { %s942_s24 = smov %s825_s27  ;;  %20 = sbr.rel (!%p18_p13) target bundleno = 4 (0x4), region = 98 }
 0x262   :  { %480 = vsyncpa [#allocation3], 1 }
 0x263   :  { %482 = vsyncpa [#allocation3 + $0x1], 1 }
 0x264   :  { %483 = vsyncpa [#allocation4], 1 }
 0x265   :  { %485 = vsyncpa [#allocation4 + $0x1], 1 }

</bundles_post_ra>
